<compile_context>
chip_gen: v5e
topology: v5e:2x2
jax: 0.10.0
libtpu: 0.0.40
codegen_flags: <defaults>
</compile_context>

<pallas_src>
import jax
import jax.numpy as jnp
from jax.experimental import pallas as pl
from jax.experimental.pallas import tpu as pltpu


def mlp_fused_kernel(x_ref, w1_ref, b1_ref, w2_ref, b2_ref, w3_ref, b3_ref,
                     o_ref):
    """Fused 3-layer, R-head tanh MLP in one kernel invocation.

    x_ref : (B, F)            f32
    w1_ref: (F, R*H1)         bf16   (heads concatenated along output dim)
    w2_ref: (R*H1, R*H2)      bf16   (block-diagonal, one block per head)
    w3_ref: (R*H2, R*D)       bf16   (block-diagonal, one block per head)
    b*_ref: (1, R*Hout)       f32
    o_ref : (B, R*D)          f32
    """
    x = x_ref[...]                                                  # (B, F)

    # Layer 1: shared input -> one wide MXU matmul over all heads.
    h = jnp.dot(x.astype(jnp.bfloat16), w1_ref[...],
                preferred_element_type=jnp.float32)                 # (B, R*H1)
    h = jnp.tanh(h + b1_ref[...])                                   # f32 VPU/EUP

    # Layer 2: block-diagonal weights -> one wide MXU matmul.
    h = jnp.dot(h.astype(jnp.bfloat16), w2_ref[...],
                preferred_element_type=jnp.float32)                 # (B, R*H2)
    h = jnp.tanh(h + b2_ref[...])

    # Layer 3: block-diagonal weights -> one wide MXU matmul.
    h = jnp.dot(h.astype(jnp.bfloat16), w3_ref[...],
                preferred_element_type=jnp.float32)                 # (B, R*D)
    h = jnp.tanh(h + b3_ref[...])

    # Single lane-dense store of the whole result slab.
    o_ref[...] = h.astype(o_ref.dtype)


def _block_diag(w):
    """(R, I, O) per-head weights -> (R*I, R*O) block-diagonal matrix."""
    R, I, O = w.shape
    eye = jnp.eye(R, dtype=w.dtype)
    # bd[r*I + i, s*O + o] = (r == s) * w[r, i, o]
    return (eye[:, None, :, None] * w[:, :, None, :]).reshape(R * I, R * O)


@jax.jit
def mlp_network_forward(x, params):
    """x: (B, n_features) f32.  Returns (R*B, rep_dim) f32 (torch row order)."""
    (w1, b1), (w2, b2), (w3, b3) = params
    R, F, H1 = w1.shape
    H2 = w2.shape[2]
    D = w3.shape[2]
    B = x.shape[0]

    # --- Pack weights for wide MXU matmuls (in production, pre-pack once). ---
    # Layer 1 shares the input batch: concatenate heads along the output dim.
    w1p = jnp.transpose(w1, (1, 0, 2)).reshape(F, R * H1).astype(jnp.bfloat16)
    # Layers 2/3 are per-head: block-diagonal so one matmul serves all heads.
    w2bd = _block_diag(w2).astype(jnp.bfloat16)                  # (R*H1, R*H2)
    w3bd = _block_diag(w3).astype(jnp.bfloat16)                  # (R*H2, R*D)
    b1p = b1.reshape(1, R * H1)                                  # f32
    b2p = b2.reshape(1, R * H2)
    b3p = b3.reshape(1, R * D)

    vmem_specs = [pl.BlockSpec(memory_space=pltpu.MemorySpace.VMEM)
                  for _ in range(7)]
    out = pl.pallas_call(
        mlp_fused_kernel,
        out_shape=jax.ShapeDtypeStruct((B, R * D), jnp.float32),
        in_specs=vmem_specs,
        out_specs=pl.BlockSpec(memory_space=pltpu.MemorySpace.VMEM),
    )(x, w1p, b1p, w2bd, b2p, w3bd, b3p)

    # torch: x.repeat(R, 1) stacks R copies of the batch along dim 0, so the
    # module's output is representation-major.  out[b, r*D+d] -> row r*B + b.
    return jnp.transpose(out.reshape(B, R, D), (1, 0, 2)).reshape(R * B, D)


def init_params(key, n_features, hidden_dims, rep_dim, R):
    dims = [n_features] + list(hidden_dims) + [rep_dim]
    params = []
    for i in range(len(dims) - 1):
        key, kw, kb = jax.random.split(key, 3)
        fan_in = dims[i]
        scale = 1.0 / jnp.sqrt(jnp.float32(fan_in))
        w = jax.random.uniform(kw, (R, dims[i], dims[i + 1]),
                               jnp.float32, -scale, scale)
        b = jax.random.uniform(kb, (R, 1, dims[i + 1]),
                               jnp.float32, -scale, scale)
        params.append((w, b))
    return params


def reference_forward_f32(x, params):
    """Pure f32 reference matching the torch module exactly."""
    R = params[0][0].shape[0]
    h = jnp.broadcast_to(x[None], (R,) + x.shape)       # repeat(R, 1)
    for w, b in params:
        h = jnp.tanh(jnp.einsum('rbi,rio->rbo', h, w) + b)
    return h.reshape(R * x.shape[0], -1)


def reference_forward_mixed(x, params):
    """Reference using the kernel's bf16-operand / f32-accumulate scheme."""
    R = params[0][0].shape[0]
    h = jnp.broadcast_to(x[None], (R,) + x.shape)
    for w, b in params:
        h = jnp.tanh(jnp.einsum('rbi,rio->rbo',
                                h.astype(jnp.bfloat16),
                                w.astype(jnp.bfloat16),
                                preferred_element_type=jnp.float32) + b)
    return h.reshape(R * x.shape[0], -1)


if __name__ == "__main__":
    # Small shapes consistent with the module's forward:
    #   n_features=16, hidden=[64, 32], representation_dim=20, R=8, batch=4
    B, F = 4, 16
    HIDDEN = [64, 32]
    REP_DIM = 20
    R = 8

    key = jax.random.PRNGKey(0)
    kx, kp = jax.random.split(key)
    x = jax.random.normal(kx, (B, F), jnp.float32)
    params = init_params(kp, F, HIDDEN, REP_DIM, R)

    y = mlp_network_forward(x, params)
    y = jax.block_until_ready(y)
    assert y.shape == (R * B, REP_DIM)

    # Tight check against a reference with the identical precision scheme.
    y_mixed = reference_forward_mixed(x, params)
    assert jnp.allclose(y, y_mixed, atol=1e-3, rtol=1e-3), \
        "mismatch vs mixed-precision reference"

    # Loose check against the pure-f32 torch-equivalent math (bf16 weights).
    y_f32 = reference_forward_f32(x, params)
    assert jnp.allclose(y, y_f32, atol=5e-2, rtol=5e-2), \
        "mismatch vs f32 reference"

    print("KERNEL_OK")
</pallas_src>

<mosaic_0001>
module attributes {stable_mosaic.version = 11 : i64} {
  func.func @mlp_fused_kernel(%arg0: memref<4x16xf32, #tpu.memory_space<vmem>>, %arg1: memref<16x512xbf16, #tpu.memory_space<vmem>>, %arg2: memref<1x512xf32, #tpu.memory_space<vmem>>, %arg3: memref<512x256xbf16, #tpu.memory_space<vmem>>, %arg4: memref<1x256xf32, #tpu.memory_space<vmem>>, %arg5: memref<256x160xbf16, #tpu.memory_space<vmem>>, %arg6: memref<1x160xf32, #tpu.memory_space<vmem>>, %arg7: memref<4x160xf32, #tpu.memory_space<vmem>>) attributes {dimension_semantics = [], scalar_prefetch = 0 : i64, scratch_operands = 0 : i64, tpu.core_type = #tpu.core_type<tc>} {
    %c0 = arith.constant 0 : index
    %c0_0 = arith.constant 0 : index
    %0 = vector.load %arg0[%c0, %c0_0] : memref<4x16xf32, #tpu.memory_space<vmem>>, vector<4x16xf32>
    %1 = arith.truncf %0 : vector<4x16xf32> to vector<4x16xbf16>
    %c0_1 = arith.constant 0 : index
    %c0_2 = arith.constant 0 : index
    %2 = vector.load %arg1[%c0_1, %c0_2] : memref<16x512xbf16, #tpu.memory_space<vmem>>, vector<16x512xbf16>
    %cst = arith.constant dense<0.000000e+00> : vector<4x512xf32>
    %3 = tpu.matmul %1, %2, %cst {dimension_numbers = #tpu.dot_dimension_numbers<[1], [0], [0], [1], [0, 0, 1, 1], [], []>} : vector<4x16xbf16>, vector<16x512xbf16>, vector<4x512xf32> -> vector<4x512xf32>
    %c0_3 = arith.constant 0 : index
    %c0_4 = arith.constant 0 : index
    %4 = vector.load %arg2[%c0_3, %c0_4] : memref<1x512xf32, #tpu.memory_space<vmem>>, vector<1x512xf32>
    %5 = vector.broadcast %4 : vector<1x512xf32> to vector<4x512xf32>
    %6 = arith.addf %3, %5 : vector<4x512xf32>
    %7 = math.tanh %6 : vector<4x512xf32>
    %8 = arith.truncf %7 : vector<4x512xf32> to vector<4x512xbf16>
    %c0_5 = arith.constant 0 : index
    %c0_6 = arith.constant 0 : index
    %9 = vector.load %arg3[%c0_5, %c0_6] : memref<512x256xbf16, #tpu.memory_space<vmem>>, vector<512x256xbf16>
    %cst_7 = arith.constant dense<0.000000e+00> : vector<4x256xf32>
    %10 = tpu.matmul %8, %9, %cst_7 {dimension_numbers = #tpu.dot_dimension_numbers<[1], [0], [0], [1], [0, 0, 1, 1], [], []>} : vector<4x512xbf16>, vector<512x256xbf16>, vector<4x256xf32> -> vector<4x256xf32>
    %c0_8 = arith.constant 0 : index
    %c0_9 = arith.constant 0 : index
    %11 = vector.load %arg4[%c0_8, %c0_9] : memref<1x256xf32, #tpu.memory_space<vmem>>, vector<1x256xf32>
    %12 = vector.broadcast %11 : vector<1x256xf32> to vector<4x256xf32>
    %13 = arith.addf %10, %12 : vector<4x256xf32>
    %14 = math.tanh %13 : vector<4x256xf32>
    %15 = arith.truncf %14 : vector<4x256xf32> to vector<4x256xbf16>
    %c0_10 = arith.constant 0 : index
    %c0_11 = arith.constant 0 : index
    %16 = vector.load %arg5[%c0_10, %c0_11] : memref<256x160xbf16, #tpu.memory_space<vmem>>, vector<256x160xbf16>
    %cst_12 = arith.constant dense<0.000000e+00> : vector<4x160xf32>
    %17 = tpu.matmul %15, %16, %cst_12 {dimension_numbers = #tpu.dot_dimension_numbers<[1], [0], [0], [1], [0, 0, 1, 1], [], []>} : vector<4x256xbf16>, vector<256x160xbf16>, vector<4x160xf32> -> vector<4x160xf32>
    %c0_13 = arith.constant 0 : index
    %c0_14 = arith.constant 0 : index
    %18 = vector.load %arg6[%c0_13, %c0_14] : memref<1x160xf32, #tpu.memory_space<vmem>>, vector<1x160xf32>
    %19 = vector.broadcast %18 : vector<1x160xf32> to vector<4x160xf32>
    %20 = arith.addf %17, %19 : vector<4x160xf32>
    %21 = math.tanh %20 : vector<4x160xf32>
    %c0_15 = arith.constant 0 : index
    %c0_16 = arith.constant 0 : index
    %22 = vector.load %arg7[%c0_15, %c0_16] : memref<4x160xf32, #tpu.memory_space<vmem>>, vector<4x160xf32>
    tpu.vector_store %arg7[%c0_15, %c0_16], %21 {strides = array<i32>} : memref<4x160xf32, #tpu.memory_space<vmem>>, vector<4x160xf32>,
    return
  }
}

</mosaic_0001>

<bundles_post_ra>
// kernel: mlp_network_forward.1
= control target key start
LH: loop header
LB: loop body
LE: loop exit
PB: predicated region body
PF: predicated region fallthrough
CT: control target
= control target key end

     0   :  { %vm63_vm0 = vcmask 130048   ;;  %vm880_vm1 = vcmask 1043456   ;;  %vm883_vm2 = vcmask 261124   ;;  %s2069_s1 = inlined_call_operand.vmem [shape: bf16[16,512], index: 1, kind: input, shape index: {}]   ;;  %s2070_s0 = inlined_call_operand.vmem [shape: f32[4,16], index: 0, kind: input, shape index: {}]   ;;  %s2071_s3 = inlined_call_operand.vmem [shape: bf16[512,256], index: 3, kind: input, shape index: {}]   ;;  %s2072_s2 = inlined_call_operand.vmem [shape: f32[1,512], index: 2, kind: input, shape index: {}]   ;;  %s2073_s5 = inlined_call_operand.vmem [shape: bf16[256,160], index: 5, kind: input, shape index: {}]   ;;  %s2074_s4 = inlined_call_operand.vmem [shape: f32[1,256], index: 4, kind: input, shape index: {}]   ;;  %s2075_s6 = inlined_call_operand.vmem [shape: f32[1,160], index: 6, kind: input, shape index: {}]   ;;  %s2076_s7 = inlined_call_operand.vmem [shape: f32[4,160], index: 7, kind: output, shape index: {}]  }
   0x1   :  { %v892_v0 = vld [vmem:[%s2069_s1] sm:$0xf]  ;;  %v1296_v1 = vld [vmem:[%s2069_s1 + $0xc] sm:$0xf0]  ;;  %v1294_v2 = vld [vmem:[%s2069_s1 + $0x4] sm:$0xf] }
   0x2   :  { %v893_v3 = vor.u32 %v1296_v1, %v892_v0  ;;  %v894_v4 = vld [vmem:[%s2069_s1 + $0x10] sm:$0xf0]  ;;  %v900_v5 = vld [vmem:[%s2069_s1 + $0x8] sm:$0xf]  ;;  %v1297_v6 = vld [vmem:[%s2069_s1 + $0x14] sm:$0xf0] }
   0x3   :  { %v897_v7 = vor.u32 %v1294_v2, %v894_v4  ;;  %v901_v8 = vor.u32 %v1297_v6, %v900_v5  ;;  %v1295_v9 = vld [vmem:[%s2069_s1 + $0xc] sm:$0xf]  ;;  %v902_v10 = vld [vmem:[%s2069_s1 + $0x18] sm:$0xf0]  ;;  %v27_v11 = vld [vmem:[%s2070_s0] sm:$0xf] }
   0x4   :  { %74 = vmatpush.bf16.msra.mxu0 %v893_v3  ;;  %v905_v12 = vor.u32 %v1295_v9, %v902_v10  ;;  %v28_v13 = vpack.c.bf16 %v27_v11, %v27_v11  ;;  %v968_v14 = vld [vmem:[%s2071_s3 + $0x70] sm:$0xf]  ;;  %v1313_v15 = vld [vmem:[%s2071_s3 + $0x74] sm:$0xf0]  ;;  %v960_v19 = vld [vmem:[%s2071_s3 + $0x60] sm:$0xf] }
   0x5   :  { %v1032_v16 = vld [vmem:[%s2071_s3 + $0xf0] sm:$0xf]  ;;  %87 = vmatpush.bf16.msra.mxu1 %v897_v7  ;;  %100 = vmatpush.bf16.msra.mxu2 %v901_v8  ;;  %v969_v17 = vor.u32 %v1313_v15, %v968_v14  ;;  %v1329_v18 = vld [vmem:[%s2071_s3 + $0xf4] sm:$0xf0]  ;;  %v1311_v20 = vld [vmem:[%s2071_s3 + $0x64] sm:$0xf0] }
   0x6   :  { %113 = vmatpush.bf16.msra.mxu3 %v905_v12  ;;  %v1033_v21 = vor.u32 %v1329_v18, %v1032_v16  ;;  %v1024_v22 = vld [vmem:[%s2071_s3 + $0xe0] sm:$0xf]  ;;  %v1327_v23 = vld [vmem:[%s2071_s3 + $0xe4] sm:$0xf0]  ;;  %v1096_v24 = vld [vmem:[%s2071_s3 + $0x170] sm:$0xf]  ;;  %v961_v30 = vor.u32 %v1311_v20, %v960_v19 }
   0x7   :  { %906 = vmatmul.msk.bf16.vlgmr.msra.gmra.mxu0 %vm63_vm0, %v28_v13  ;;  %v1345_v25 = vld [vmem:[%s2071_s3 + $0x174] sm:$0xf0]  ;;  %v1160_v26 = vld [vmem:[%s2071_s3 + $0x1f0] sm:$0xf]  ;;  %v1088_v32 = vld [vmem:[%s2071_s3 + $0x160] sm:$0xf]  ;;  %v1025_v34 = vor.u32 %v1327_v23, %v1024_v22 }
   0x8   :  { %v1361_v27 = vld [vmem:[%s2071_s3 + $0x1f4] sm:$0xf0]  ;;  %907 = vmatmul.msk.bf16.vlgmr.msra.gmra.mxu1 %vm63_vm0, %v28_v13  ;;  %908 = vmatmul.msk.bf16.vlgmr.msra.gmra.mxu2 %vm63_vm0, %v28_v13  ;;  %v1097_v28 = vor.u32 %v1345_v25, %v1096_v24  ;;  %v952_v31 = vld [vmem:[%s2071_s3 + $0x50] sm:$0xf]  ;;  %v1343_v33 = vld [vmem:[%s2071_s3 + $0x164] sm:$0xf0] }
   0x9   :  { %v1161_v29 = vor.u32 %v1361_v27, %v1160_v26  ;;  %909 = vmatmul.msk.bf16.vlgmr.msra.gmra.mxu3 %vm63_vm0, %v28_v13  ;;  %517 = vmatpush.bf16.msrb.mxu0 %v969_v17  ;;  %v1309_v35 = vld [vmem:[%s2071_s3 + $0x54] sm:$0xf0]  ;;  %v1089_v36 = vor.u32 %v1343_v33, %v1088_v32  ;;  %v1152_v37 = vld [vmem:[%s2071_s3 + $0x1e0] sm:$0xf]  ;;  %v1359_v38 = vld [vmem:[%s2071_s3 + $0x1e4] sm:$0xf0] }
   0xa   :  { %530 = vmatpush.bf16.msrb.mxu1 %v1033_v21  ;;  %543 = vmatpush.bf16.msrb.mxu2 %v1097_v28  ;;  %v1016_v39 = vld [vmem:[%s2071_s3 + $0xd0] sm:$0xf]  ;;  %v1325_v40 = vld [vmem:[%s2071_s3 + $0xd4] sm:$0xf0]  ;;  %v1153_v41 = vor.u32 %v1359_v38, %v1152_v37  ;;  %v953_v45 = vor.u32 %v1309_v35, %v952_v31  ;;  %v944_v48 = vld [vmem:[%s2071_s3 + $0x40] sm:$0xf] }
   0xb   :  { %556 = vmatpush.bf16.msrb.mxu3 %v1161_v29  ;;  %v1080_v42 = vld [vmem:[%s2071_s3 + $0x150] sm:$0xf]  ;;  %v1341_v43 = vld [vmem:[%s2071_s3 + $0x154] sm:$0xf0]  ;;  %v1017_v47 = vor.u32 %v1325_v40, %v1016_v39  ;;  %v1307_v49 = vld [vmem:[%s2071_s3 + $0x44] sm:$0xf0] }
   0xc   :  { %v1144_v44 = vld [vmem:[%s2071_s3 + $0x1d0] sm:$0xf]  ;;  %v1357_v46 = vld [vmem:[%s2071_s3 + $0x1d4] sm:$0xf0]  ;;  %v1008_v50 = vld [vmem:[%s2071_s3 + $0xc0] sm:$0xf]  ;;  %v1081_v51 = vor.u32 %v1341_v43, %v1080_v42  ;;  %v945_v58 = vor.u32 %v1307_v49, %v944_v48 }
   0xd   :  { %518 = vmatpush.bf16.msrb.mxu0 %v961_v30  ;;  %v1323_v52 = vld [vmem:[%s2071_s3 + $0xc4] sm:$0xf0]  ;;  %v1145_v53 = vor.u32 %v1357_v46, %v1144_v44  ;;  %v1072_v54 = vld [vmem:[%s2071_s3 + $0x140] sm:$0xf]  ;;  %v936_v60 = vld [vmem:[%s2071_s3 + $0x30] sm:$0xf] }
   0xe   :  { %531 = vmatpush.bf16.msrb.mxu1 %v1025_v34  ;;  %544 = vmatpush.bf16.msrb.mxu2 %v1089_v36  ;;  %v1339_v55 = vld [vmem:[%s2071_s3 + $0x144] sm:$0xf0]  ;;  %v1136_v56 = vld [vmem:[%s2071_s3 + $0x1c0] sm:$0xf]  ;;  %v1009_v59 = vor.u32 %v1323_v52, %v1008_v50  ;;  %v1305_v61 = vld [vmem:[%s2071_s3 + $0x34] sm:$0xf0] }
   0xf   :  { %557 = vmatpush.bf16.msrb.mxu3 %v1153_v41  ;;  %v1355_v57 = vld [vmem:[%s2071_s3 + $0x1c4] sm:$0xf0]  ;;  %v1000_v62 = vld [vmem:[%s2071_s3 + $0xb0] sm:$0xf]  ;;  %v1073_v63 = vor.u32 %v1339_v55, %v1072_v54  ;;  %v1321_v0 = vld [vmem:[%s2071_s3 + $0xb4] sm:$0xf0]  ;;  %v937_v6 = vor.u32 %v1305_v61, %v936_v60 }
  0x10   :  { %v1137_v1 = vor.u32 %v1355_v57, %v1136_v56  ;;  %v1064_v2 = vld [vmem:[%s2071_s3 + $0x130] sm:$0xf]  ;;  %v1337_v3 = vld [vmem:[%s2071_s3 + $0x134] sm:$0xf0]  ;;  %v1001_v7 = vor.u32 %v1321_v0, %v1000_v62  ;;  %v928_v8 = vld [vmem:[%s2071_s3 + $0x20] sm:$0xf] }
  0x11   :  { %519 = vmatpush.bf16.msrb.mxu0 %v953_v45  ;;  %v1128_v4 = vld [vmem:[%s2071_s3 + $0x1b0] sm:$0xf]  ;;  %v1353_v5 = vld [vmem:[%s2071_s3 + $0x1b4] sm:$0xf0]  ;;  %v1303_v9 = vld [vmem:[%s2071_s3 + $0x24] sm:$0xf0]  ;;  %v1065_v11 = vor.u32 %v1337_v3, %v1064_v2 }
  0x12   :  { %532 = vmatpush.bf16.msrb.mxu1 %v1017_v47  ;;  %545 = vmatpush.bf16.msrb.mxu2 %v1081_v51  ;;  %v992_v10 = vld [vmem:[%s2071_s3 + $0xa0] sm:$0xf]  ;;  %v1319_v12 = vld [vmem:[%s2071_s3 + $0xa4] sm:$0xf0]  ;;  %v1129_v13 = vor.u32 %v1353_v5, %v1128_v4  ;;  %v929_v18 = vor.u32 %v1303_v9, %v928_v8  ;;  %v920_v20 = vld [vmem:[%s2071_s3 + $0x10] sm:$0xf] }
  0x13   :  { %558 = vmatpush.bf16.msrb.mxu3 %v1145_v53  ;;  %v1056_v14 = vld [vmem:[%s2071_s3 + $0x120] sm:$0xf]  ;;  %v1335_v15 = vld [vmem:[%s2071_s3 + $0x124] sm:$0xf0]  ;;  %v993_v19 = vor.u32 %v1319_v12, %v992_v10  ;;  %v1301_v21 = vld [vmem:[%s2071_s3 + $0x14] sm:$0xf0] }
  0x14   :  { %v1120_v16 = vld [vmem:[%s2071_s3 + $0x1a0] sm:$0xf]  ;;  %v1351_v17 = vld [vmem:[%s2071_s3 + $0x1a4] sm:$0xf0]  ;;  %v984_v22 = vld [vmem:[%s2071_s3 + $0x90] sm:$0xf]  ;;  %v1057_v23 = vor.u32 %v1335_v15, %v1056_v14  ;;  %v921_v30 = vor.u32 %v1301_v21, %v920_v20 }
  0x15   :  { %520 = vmatpush.bf16.msrb.mxu0 %v945_v58  ;;  %v1317_v24 = vld [vmem:[%s2071_s3 + $0x94] sm:$0xf0]  ;;  %v1121_v25 = vor.u32 %v1351_v17, %v1120_v16  ;;  %v1048_v26 = vld [vmem:[%s2071_s3 + $0x110] sm:$0xf]  ;;  %v912_v32 = vld [vmem:[%s2071_s3] sm:$0xf] }
  0x16   :  { %533 = vmatpush.bf16.msrb.mxu1 %v1009_v59  ;;  %546 = vmatpush.bf16.msrb.mxu2 %v1073_v63  ;;  %v1333_v27 = vld [vmem:[%s2071_s3 + $0x114] sm:$0xf0]  ;;  %v1112_v28 = vld [vmem:[%s2071_s3 + $0x190] sm:$0xf]  ;;  %v985_v31 = vor.u32 %v1317_v24, %v984_v22  ;;  %v1299_v33 = vld [vmem:[%s2071_s3 + $0x4] sm:$0xf0] }
  0x17   :  { %559 = vmatpush.bf16.msrb.mxu3 %v1137_v1  ;;  %v1349_v29 = vld [vmem:[%s2071_s3 + $0x194] sm:$0xf0]  ;;  %v976_v34 = vld [vmem:[%s2071_s3 + $0x80] sm:$0xf]  ;;  %v1049_v35 = vor.u32 %v1333_v27, %v1048_v26  ;;  %v1315_v36 = vld [vmem:[%s2071_s3 + $0x84] sm:$0xf0]  ;;  %v913_v42 = vor.u32 %v1299_v33, %v912_v32 }
  0x18   :  { %v1312_v37 = vld [vmem:[%s2071_s3 + $0x74] sm:$0xf]  ;;  %v970_v38 = vld [vmem:[%s2071_s3 + $0x78] sm:$0xf0]  ;;  %v1113_v39 = vor.u32 %v1349_v29, %v1112_v28  ;;  %v977_v43 = vor.u32 %v1315_v36, %v976_v34  ;;  %v1310_v46 = vld [vmem:[%s2071_s3 + $0x64] sm:$0xf] }
  0x19   :  { %521 = vmatpush.bf16.msrb.mxu0 %v937_v6  ;;  %v1328_v40 = vld [vmem:[%s2071_s3 + $0xf4] sm:$0xf]  ;;  %v1034_v41 = vld [vmem:[%s2071_s3 + $0xf8] sm:$0xf0]  ;;  %v973_v44 = vor.u32 %v1312_v37, %v970_v38  ;;  %v962_v47 = vld [vmem:[%s2071_s3 + $0x68] sm:$0xf0] }
  0x1a   :  { %534 = vmatpush.bf16.msrb.mxu1 %v1001_v7  ;;  %547 = vmatpush.bf16.msrb.mxu2 %v1065_v11  ;;  %v1037_v45 = vor.u32 %v1328_v40, %v1034_v41  ;;  %v1326_v48 = vld [vmem:[%s2071_s3 + $0xe4] sm:$0xf]  ;;  %v965_v49 = vor.u32 %v1310_v46, %v962_v47  ;;  %v1026_v50 = vld [vmem:[%s2071_s3 + $0xe8] sm:$0xf0]  ;;  %v1040_v51 = vld [vmem:[%s2071_s3 + $0x100] sm:$0xf] }
  0x1b   :  { %560 = vmatpush.bf16.msrb.mxu3 %v1129_v13  ;;  %v1029_v52 = vor.u32 %v1326_v48, %v1026_v50  ;;  %v1331_v53 = vld [vmem:[%s2071_s3 + $0x104] sm:$0xf0]  ;;  %v1104_v54 = vld [vmem:[%s2071_s3 + $0x180] sm:$0xf]  ;;  %v1344_v58 = vld [vmem:[%s2071_s3 + $0x174] sm:$0xf] }
  0x1c   :  { %v1347_v55 = vld [vmem:[%s2071_s3 + $0x184] sm:$0xf0]  ;;  %v1041_v56 = vor.u32 %v1331_v53, %v1040_v51  ;;  %v1098_v59 = vld [vmem:[%s2071_s3 + $0x178] sm:$0xf0]  ;;  %v1360_v60 = vld [vmem:[%s2071_s3 + $0x1f4] sm:$0xf] }
  0x1d   :  { %522 = vmatpush.bf16.msrb.mxu0 %v929_v18  ;;  %v1105_v57 = vor.u32 %v1347_v55, %v1104_v54  ;;  %v1101_v61 = vor.u32 %v1344_v58, %v1098_v59  ;;  %v1162_v62 = vld [vmem:[%s2071_s3 + $0x1f8] sm:$0xf0]  ;;  %v1308_v63 = vld [vmem:[%s2071_s3 + $0x54] sm:$0xf]  ;;  %v1342_v6 = vld [vmem:[%s2071_s3 + $0x164] sm:$0xf] }
  0x1e   :  { %535 = vmatpush.bf16.msrb.mxu1 %v993_v19  ;;  %548 = vmatpush.bf16.msrb.mxu2 %v1057_v23  ;;  %v954_v0 = vld [vmem:[%s2071_s3 + $0x58] sm:$0xf0]  ;;  %v1165_v1 = vor.u32 %v1360_v60, %v1162_v62  ;;  %v1324_v3 = vld [vmem:[%s2071_s3 + $0xd4] sm:$0xf]  ;;  %v1090_v7 = vld [vmem:[%s2071_s3 + $0x168] sm:$0xf0] }
  0x1f   :  { %561 = vmatpush.bf16.msrb.mxu3 %v1121_v25  ;;  %v957_v2 = vor.u32 %v1308_v63, %v954_v0  ;;  %v1018_v4 = vld [vmem:[%s2071_s3 + $0xd8] sm:$0xf0]  ;;  %v1358_v8 = vld [vmem:[%s2071_s3 + $0x1e4] sm:$0xf]  ;;  %v1093_v9 = vor.u32 %v1342_v6, %v1090_v7  ;;  %v1154_v10 = vld [vmem:[%s2071_s3 + $0x1e8] sm:$0xf0] }
  0x20   :  { %v1021_v5 = vor.u32 %v1324_v3, %v1018_v4  ;;  %v1157_v11 = vor.u32 %v1358_v8, %v1154_v10  ;;  %v1306_v12 = vld [vmem:[%s2071_s3 + $0x44] sm:$0xf]  ;;  %v946_v13 = vld [vmem:[%s2071_s3 + $0x48] sm:$0xf0]  ;;  %v1340_v18 = vld [vmem:[%s2071_s3 + $0x154] sm:$0xf] }
  0x21   :  { %523 = vmatpush.bf16.msrb.mxu0 %v921_v30  ;;  %v1322_v14 = vld [vmem:[%s2071_s3 + $0xc4] sm:$0xf]  ;;  %v949_v15 = vor.u32 %v1306_v12, %v946_v13  ;;  %v1010_v16 = vld [vmem:[%s2071_s3 + $0xc8] sm:$0xf0]  ;;  %v1082_v19 = vld [vmem:[%s2071_s3 + $0x158] sm:$0xf0] }
  0x22   :  { %536 = vmatpush.bf16.msrb.mxu1 %v985_v31  ;;  %549 = vmatpush.bf16.msrb.mxu2 %v1049_v35  ;;  %v1013_v17 = vor.u32 %v1322_v14, %v1010_v16  ;;  %v1356_v20 = vld [vmem:[%s2071_s3 + $0x1d4] sm:$0xf]  ;;  %v1085_v21 = vor.u32 %v1340_v18, %v1082_v19  ;;  %v1146_v22 = vld [vmem:[%s2071_s3 + $0x1d8] sm:$0xf0]  ;;  %v1338_v30 = vld [vmem:[%s2071_s3 + $0x144] sm:$0xf] }
  0x23   :  { %562 = vmatpush.bf16.msrb.mxu3 %v1113_v39  ;;  %v1149_v23 = vor.u32 %v1356_v20, %v1146_v22  ;;  %v1304_v24 = vld [vmem:[%s2071_s3 + $0x34] sm:$0xf]  ;;  %v938_v25 = vld [vmem:[%s2071_s3 + $0x38] sm:$0xf0]  ;;  %v1074_v31 = vld [vmem:[%s2071_s3 + $0x148] sm:$0xf0] }
  0x24   :  { %v1320_v26 = vld [vmem:[%s2071_s3 + $0xb4] sm:$0xf]  ;;  %v941_v27 = vor.u32 %v1304_v24, %v938_v25  ;;  %v1002_v28 = vld [vmem:[%s2071_s3 + $0xb8] sm:$0xf0]  ;;  %v1354_v32 = vld [vmem:[%s2071_s3 + $0x1c4] sm:$0xf]  ;;  %v1077_v33 = vor.u32 %v1338_v30, %v1074_v31 }
  0x25   :  { %524 = vmatpush.bf16.msrb.mxu0 %v913_v42  ;;  %v1005_v29 = vor.u32 %v1320_v26, %v1002_v28  ;;  %v1138_v34 = vld [vmem:[%s2071_s3 + $0x1c8] sm:$0xf0]  ;;  %v1302_v36 = vld [vmem:[%s2071_s3 + $0x24] sm:$0xf]  ;;  %v1336_v42 = vld [vmem:[%s2071_s3 + $0x134] sm:$0xf] }
  0x26   :  { %537 = vmatpush.bf16.msrb.mxu1 %v977_v43  ;;  %550 = vmatpush.bf16.msrb.mxu2 %v1041_v56  ;;  %v1141_v35 = vor.u32 %v1354_v32, %v1138_v34  ;;  %v930_v37 = vld [vmem:[%s2071_s3 + $0x28] sm:$0xf0]  ;;  %v1318_v38 = vld [vmem:[%s2071_s3 + $0xa4] sm:$0xf]  ;;  %v1066_v43 = vld [vmem:[%s2071_s3 + $0x138] sm:$0xf0] }
  0x27   :  { %563 = vmatpush.bf16.msrb.mxu3 %v1105_v57  ;;  %v933_v39 = vor.u32 %v1302_v36, %v930_v37  ;;  %v994_v40 = vld [vmem:[%s2071_s3 + $0xa8] sm:$0xf0]  ;;  %v1130_v46 = vld [vmem:[%s2071_s3 + $0x1b8] sm:$0xf0]  ;;  %v1300_v48 = vld [vmem:[%s2071_s3 + $0x14] sm:$0xf] }
  0x28   :  { %v997_v41 = vor.u32 %v1318_v38, %v994_v40  ;;  %v1316_v50 = vld [vmem:[%s2071_s3 + $0x94] sm:$0xf]  ;;  %v1334_v53 = vld [vmem:[%s2071_s3 + $0x124] sm:$0xf]  ;;  %v1058_v54 = vld [vmem:[%s2071_s3 + $0x128] sm:$0xf0] }
  0x29   :  { %569 = vmatpush.bf16.msra.mxu0 %v973_v44  ;;  %v1352_v44 = vld [vmem:[%s2071_s3 + $0x1b4] sm:$0xf]  ;;  %v1061_v56 = vor.u32 %v1334_v53, %v1058_v54  ;;  %v1350_v57 = vld [vmem:[%s2071_s3 + $0x1a4] sm:$0xf]  ;;  %v1122_v58 = vld [vmem:[%s2071_s3 + $0x1a8] sm:$0xf0] }
  0x2a   :  { %582 = vmatpush.bf16.msra.mxu1 %v1037_v45  ;;  %595 = vmatpush.bf16.msra.mxu2 %v1101_v61  ;;  %v1069_v45 = vor.u32 %v1336_v42, %v1066_v43  ;;  %v1133_v47 = vor.u32 %v1352_v44, %v1130_v46  ;;  %v1298_v59 = vld [vmem:[%s2071_s3 + $0x4] sm:$0xf]  ;;  %v1125_v60 = vor.u32 %v1350_v57, %v1122_v58  ;;  %v914_v61 = vld [vmem:[%s2071_s3 + $0x8] sm:$0xf0]  ;;  %v1050_v3 = vld [vmem:[%s2071_s3 + $0x118] sm:$0xf0] }
  0x2b   :  { %608 = vmatpush.bf16.msra.mxu3 %v1165_v1  ;;  %v1314_v62 = vld [vmem:[%s2071_s3 + $0x84] sm:$0xf]  ;;  %v978_v63 = vld [vmem:[%s2071_s3 + $0x88] sm:$0xf0]  ;;  %v917_v0 = vor.u32 %v1298_v59, %v914_v61  ;;  %v1348_v4 = vld [vmem:[%s2071_s3 + $0x194] sm:$0xf] }
  0x2c   :  { %v981_v1 = vor.u32 %v1314_v62, %v978_v63  ;;  %v1114_v6 = vld [vmem:[%s2071_s3 + $0x198] sm:$0xf0]  ;;  %v1330_v10 = vld [vmem:[%s2071_s3 + $0x104] sm:$0xf]  ;;  %v1377_v24 = vld [vmem:[%s2073_s5 + $0x74] sm:$0xf0] }
  0x2d   :  { %570 = vmatpush.bf16.msra.mxu0 %v965_v49  ;;  %v922_v49 = vld [vmem:[%s2071_s3 + $0x18] sm:$0xf0]  ;;  %v1117_v8 = vor.u32 %v1348_v4, %v1114_v6  ;;  %v1346_v12 = vld [vmem:[%s2071_s3 + $0x184] sm:$0xf]  ;;  %v1375_v36 = vld [vmem:[%s2073_s5 + $0x64] sm:$0xf0] }
  0x2e   :  { %583 = vmatpush.bf16.msra.mxu1 %v1029_v52  ;;  %596 = vmatpush.bf16.msra.mxu2 %v1093_v9  ;;  %v925_v51 = vor.u32 %v1300_v48, %v922_v49  ;;  %v986_v52 = vld [vmem:[%s2071_s3 + $0x98] sm:$0xf0]  ;;  %v1376_v38 = vld [vmem:[%s2073_s5 + $0x74] sm:$0xf]  ;;  %v1218_v48 = vld [vmem:[%s2073_s5 + $0x68] sm:$0xf0] }
  0x2f   :  { %609 = vmatpush.bf16.msra.mxu3 %v1157_v11  ;;  %v989_v55 = vor.u32 %v1316_v50, %v986_v52  ;;  %v1042_v11 = vld [vmem:[%s2071_s3 + $0x108] sm:$0xf0]  ;;  %v1373_v52 = vld [vmem:[%s2073_s5 + $0x54] sm:$0xf0]  ;;  %v1372_v53 = vld [vmem:[%s2073_s5 + $0x54] sm:$0xf] }
  0x30   :  { %v1045_v14 = vor.u32 %v1330_v10, %v1042_v11  ;;  %v1371_v57 = vld [vmem:[%s2073_s5 + $0x44] sm:$0xf0]  ;;  %v1370_v59 = vld [vmem:[%s2073_s5 + $0x44] sm:$0xf]  ;;  %v1192_v63 = vld [vmem:[%s2073_s5 + $0x30] sm:$0xf] }
  0x31   :  { %571 = vmatpush.bf16.msra.mxu0 %v957_v2  ;;  %v1332_v2 = vld [vmem:[%s2071_s3 + $0x114] sm:$0xf]  ;;  %v1184_v11 = vld [vmem:[%s2073_s5 + $0x20] sm:$0xf]  ;;  %vm884_vm3 = vmor %vm883_vm2, %vm880_vm1 }
  0x32   :  { %584 = vmatpush.bf16.msra.mxu1 %v1021_v5  ;;  %597 = vmatpush.bf16.msra.mxu2 %v1085_v21  ;;  %v33_v5 = vld [vmem:[%s2072_s2] sm:$0xf]  ;;  %v1053_v7 = vor.u32 %v1332_v2, %v1050_v3  ;;  %v1393_v3 = vld [vmem:[%s2073_s5 + $0xf4] sm:$0xf0]  ;;  %v1368_v4 = vld [vmem:[%s2073_s5 + $0x34] sm:$0xf] }
  0x33   :  { %610 = vmatpush.bf16.msra.mxu3 %v1149_v23  ;;  %v35_v9 = vperm.slane %v33_v5, 0  ;;  %v36_v13 = vperm.slane %v33_v5, 1  ;;  %v37_v21 = vperm.slane %v33_v5, 2  ;;  %v38_v22 = vperm.slane %v33_v5, 3  ;;  %v1224_v23 = vld [vmem:[%s2073_s5 + $0x70] sm:$0xf] }
  0x34   :  { %v1225_v32 = vor.u32 %v1377_v24, %v1224_v23  ;;  %v1194_v5 = vld [vmem:[%s2073_s5 + $0x38] sm:$0xf0]  ;;  %v1176_v23 = vld [vmem:[%s2073_s5 + $0x10] sm:$0xf]  ;;  %v1365_v24 = vld [vmem:[%s2073_s5 + $0x14] sm:$0xf0] }
  0x35   :  { %572 = vmatpush.bf16.msra.mxu0 %v949_v15  ;;  %v1106_v15 = vld [vmem:[%s2071_s3 + $0x188] sm:$0xf0] }
  0x36   :  { %585 = vmatpush.bf16.msra.mxu1 %v1013_v17  ;;  %598 = vmatpush.bf16.msra.mxu2 %v1077_v33  ;;  %v1109_v16 = vor.u32 %v1346_v12, %v1106_v15  ;;  %v1367_v12 = vld [vmem:[%s2073_s5 + $0x24] sm:$0xf0] }
  0x37   :  { %611 = vmatpush.bf16.msra.mxu3 %v1141_v35  ;;  %v1216_v35 = vld [vmem:[%s2073_s5 + $0x60] sm:$0xf]  ;;  %v1391_v15 = vld [vmem:[%s2073_s5 + $0xe4] sm:$0xf0] }
  0x38   :  { %v1217_v40 = vor.u32 %v1375_v36, %v1216_v35  ;;  %v1168_v35 = vld [vmem:[%s2073_s5] sm:$0xf]  ;;  %v1363_v36 = vld [vmem:[%s2073_s5 + $0x4] sm:$0xf0] }
  0x39   :  { %573 = vmatpush.bf16.msra.mxu0 %v941_v27 }
  0x3a   :  { %586 = vmatpush.bf16.msra.mxu1 %v1005_v29  ;;  %599 = vmatpush.bf16.msra.mxu2 %v1069_v45 }
  0x3b   :  { %612 = vmatpush.bf16.msra.mxu3 %v1133_v47  ;;  %v1374_v47 = vld [vmem:[%s2073_s5 + $0x64] sm:$0xf] }
  0x3c   :  { %v1221_v50 = vor.u32 %v1374_v47, %v1218_v48  ;;  %v1256_v47 = vld [vmem:[%s2073_s5 + $0xb0] sm:$0xf]  ;;  %v1385_v48 = vld [vmem:[%s2073_s5 + $0xb4] sm:$0xf0] }
  0x3d   :  { %574 = vmatpush.bf16.msra.mxu0 %v933_v39  ;;  %v1226_v39 = vld [vmem:[%s2073_s5 + $0x78] sm:$0xf0] }
  0x3e   :  { %587 = vmatpush.bf16.msra.mxu1 %v997_v41  ;;  %600 = vmatpush.bf16.msra.mxu2 %v1061_v56  ;;  %v1229_v44 = vor.u32 %v1376_v38, %v1226_v39  ;;  %v1200_v56 = vld [vmem:[%s2073_s5 + $0x40] sm:$0xf]  ;;  %v1169_v38 = vor.u32 %v1363_v36, %v1168_v35  ;;  %v1387_v39 = vld [vmem:[%s2073_s5 + $0xc4] sm:$0xf0] }
  0x3f   :  { %613 = vmatpush.bf16.msra.mxu3 %v1125_v60  ;;  %v1202_v60 = vld [vmem:[%s2073_s5 + $0x48] sm:$0xf0]  ;;  %v1201_v61 = vor.u32 %v1371_v57, %v1200_v56  ;;  %v1382_v56 = vld [vmem:[%s2073_s5 + $0xa4] sm:$0xf] }
  0x40   :  { %v1205_v62 = vor.u32 %v1370_v59, %v1202_v60 }
  0x41   :  { %575 = vmatpush.bf16.msra.mxu0 %v925_v51  ;;  %v1208_v51 = vld [vmem:[%s2073_s5 + $0x50] sm:$0xf] }
  0x42   :  { %588 = vmatpush.bf16.msra.mxu1 %v989_v55  ;;  %601 = vmatpush.bf16.msra.mxu2 %v1053_v7  ;;  %v1209_v54 = vor.u32 %v1373_v52, %v1208_v51  ;;  %v1210_v55 = vld [vmem:[%s2073_s5 + $0x58] sm:$0xf0]  ;;  %v1197_v7 = vor.u32 %v1368_v4, %v1194_v5 }
  0x43   :  { %614 = vmatpush.bf16.msra.mxu3 %v1117_v8  ;;  %v1213_v58 = vor.u32 %v1372_v53, %v1210_v55  ;;  %v1392_v8 = vld [vmem:[%s2073_s5 + $0xf4] sm:$0xf]  ;;  %v1258_v51 = vld [vmem:[%s2073_s5 + $0xb8] sm:$0xf0]  ;;  %v191_v53 = vld [vmem:[%s2074_s4] sm:$0x3] }
  0x44   :  { %v1383_v55 = vld [vmem:[%s2073_s5 + $0xa4] sm:$0xf0] }
  0x45   :  { %576 = vmatpush.bf16.msra.mxu0 %v917_v0  ;;  %v1369_v0 = vld [vmem:[%s2073_s5 + $0x34] sm:$0xf0] }
  0x46   :  { %589 = vmatpush.bf16.msra.mxu1 %v981_v1  ;;  %602 = vmatpush.bf16.msra.mxu2 %v1045_v14  ;;  %v1288_v1 = vld [vmem:[%s2073_s5 + $0xf0] sm:$0xf]  ;;  %v1193_v2 = vor.u32 %v1369_v0, %v1192_v63  ;;  %v1185_v14 = vor.u32 %v1367_v12, %v1184_v11  ;;  %v1381_v0 = vld [vmem:[%s2073_s5 + $0x94] sm:$0xf0] }
  0x47   :  { %615 = vmatpush.bf16.msra.mxu3 %v1109_v16  ;;  %v1289_v6 = vor.u32 %v1393_v3, %v1288_v1  ;;  %v1366_v16 = vld [vmem:[%s2073_s5 + $0x24] sm:$0xf]  ;;  %v1240_v63 = vld [vmem:[%s2073_s5 + $0x90] sm:$0xf]  ;;  %v1380_v1 = vld [vmem:[%s2073_s5 + $0x94] sm:$0xf] }
  0x48   :  { %v1242_v3 = vld [vmem:[%s2073_s5 + $0x98] sm:$0xf0] }
  0x49   :  { %v1245_v4 = vor.u32 %v1380_v1, %v1242_v3 }
  0x84   :  { %v76_v17 = vpop.f32.mrf.mxu0 }
  0x85   :  { %v77_v18 = vadd.f32 %v76_v17, %v35_v9  ;;  %v89_v19 = vpop.f32.mrf.mxu1  ;;  %v1290_v9 = vld [vmem:[%s2073_s5 + $0xf8] sm:$0xf0]  ;;  %v1186_v17 = vld [vmem:[%s2073_s5 + $0x28] sm:$0xf0] }
  0x86   :  { %v90_v20 = vadd.f32 %v89_v19, %v36_v13  ;;  %v1293_v10 = vor.u32 %v1392_v8, %v1290_v9  ;;  %v1280_v13 = vld [vmem:[%s2073_s5 + $0xe0] sm:$0xf]  ;;  %v1189_v19 = vor.u32 %v1366_v16, %v1186_v17  ;;  %v1378_v8 = vld [vmem:[%s2073_s5 + $0x84] sm:$0xf] }
  0x87   :  { %1394 = vtanh.f32 %v77_v18  ;;  %v1281_v18 = vor.u32 %v1391_v15, %v1280_v13 }
  0x88   :  { %1396 = vtanh.f32 %v90_v20  ;;  %v1390_v20 = vld [vmem:[%s2073_s5 + $0xe4] sm:$0xf] }
  0x8b   :  { %v102_v25 = vpop.f32.mrf.mxu2 }
  0x8c   :  { %v103_v26 = vadd.f32 %v102_v25, %v37_v21  ;;  %v115_v27 = vpop.f32.mrf.mxu3  ;;  %v78_v28 = vpop.f32.mrf.mxu0  ;;  %v1282_v21 = vld [vmem:[%s2073_s5 + $0xe8] sm:$0xf0]  ;;  %v1272_v25 = vld [vmem:[%s2073_s5 + $0xd0] sm:$0xf] }
  0x8d   :  { %v1395_v29 = vpop.eup %1394  ;;  %v116_v30 = vadd.f32 %v115_v27, %v38_v22  ;;  %v91_v31 = vpop.f32.mrf.mxu1  ;;  %v1285_v22 = vor.u32 %v1390_v20, %v1282_v21  ;;  %v1389_v27 = vld [vmem:[%s2073_s5 + $0xd4] sm:$0xf0]  ;;  %v1364_v28 = vld [vmem:[%s2073_s5 + $0x14] sm:$0xf]  ;;  %v194_v21 = vperm.slane %v191_v53, 1 }
  0x8e   :  { %v1397_v33 = vpop.eup %1396  ;;  %v123_v34 = vpack.c.bf16 %v1395_v29, %v1395_v29  ;;  %1398 = vtanh.f32 %v103_v26  ;;  %v1177_v26 = vor.u32 %v1365_v24, %v1176_v23  ;;  %v1178_v29 = vld [vmem:[%s2073_s5 + $0x18] sm:$0xf0] }
  0x8f   :  { %v124_v37 = vpack.c.bf16 %v1397_v33, %v1397_v33  ;;  %1400 = vtanh.f32 %v116_v30  ;;  %v1273_v30 = vor.u32 %v1389_v27, %v1272_v25  ;;  %v1181_v31 = vor.u32 %v1364_v28, %v1178_v29  ;;  %v1274_v33 = vld [vmem:[%s2073_s5 + $0xd8] sm:$0xf0] }
  0x90   :  { %525 = vmatmul.bf16.vlgmr.msrb.gmra.mxu0 %v123_v34 }
  0x91   :  { %538 = vmatmul.bf16.vlgmr.msrb.gmra.mxu1 %v124_v37  ;;  %823 = vmatpush.bf16.msrb.mxu0 %v1225_v32  ;;  %v1388_v32 = vld [vmem:[%s2073_s5 + $0xd4] sm:$0xf] }
  0x92   :  { %836 = vmatpush.bf16.msrb.mxu1 %v1289_v6  ;;  %v1232_v6 = vld [vmem:[%s2073_s5 + $0x80] sm:$0xf] }
  0x93   :  { %v104_v41 = vpop.f32.mrf.mxu2 }
  0x94   :  { %v1399_v42 = vpop.eup %1398  ;;  %v117_v43 = vpop.f32.mrf.mxu3  ;;  %v1170_v41 = vld [vmem:[%s2073_s5 + $0x8] sm:$0xf0] }
  0x95   :  { %v1401_v45 = vpop.eup %1400  ;;  %v125_v46 = vpack.c.bf16 %v1399_v42, %v1399_v42  ;;  %824 = vmatpush.bf16.msrb.mxu0 %v1217_v40  ;;  %v1362_v40 = vld [vmem:[%s2073_s5 + $0x4] sm:$0xf] }
  0x96   :  { %v126_v49 = vpack.c.bf16 %v1401_v45, %v1401_v45  ;;  %837 = vmatpush.bf16.msrb.mxu1 %v1281_v18  ;;  %v1173_v43 = vor.u32 %v1362_v40, %v1170_v41  ;;  %v1266_v45 = vld [vmem:[%s2073_s5 + $0xc8] sm:$0xf0]  ;;  %v657_v41 = vld [vmem:[%s2075_s6] sm:$0x3] }
  0x97   :  { %551 = vmatmul.bf16.vlgmr.msrb.gmra.mxu2 %v125_v46 }
  0x98   :  { %564 = vmatmul.bf16.vlgmr.msrb.gmra.mxu3 %v126_v49  ;;  %849 = vmatpush.bf16.msrb.mxu2 %v1229_v44  ;;  %v1386_v44 = vld [vmem:[%s2073_s5 + $0xc4] sm:$0xf] }
  0x99   :  { %825 = vmatpush.bf16.msrb.mxu0 %v1209_v54  ;;  %862 = vmatpush.bf16.msrb.mxu3 %v1293_v10  ;;  %v1248_v54 = vld [vmem:[%s2073_s5 + $0xa0] sm:$0xf]  ;;  %v1234_v10 = vld [vmem:[%s2073_s5 + $0x88] sm:$0xf0] }
  0x9a   :  { %838 = vmatpush.bf16.msrb.mxu1 %v1273_v30  ;;  %v1249_v57 = vor.u32 %v1383_v55, %v1248_v54  ;;  %v1237_v12 = vor.u32 %v1378_v8, %v1234_v10 }
  0x9c   :  { %850 = vmatpush.bf16.msrb.mxu2 %v1221_v50  ;;  %v1257_v50 = vor.u32 %v1385_v48, %v1256_v47 }
  0x9d   :  { %826 = vmatpush.bf16.msrb.mxu0 %v1201_v61  ;;  %863 = vmatpush.bf16.msrb.mxu3 %v1285_v22  ;;  %v193_v61 = vperm.slane %v191_v53, 0 }
  0xa0   :  { %577 = vmatmul.bf16.vlgmr.msra.gmra.mxu0 %v123_v34  ;;  %851 = vmatpush.bf16.msrb.mxu2 %v1213_v58  ;;  %v1277_v34 = vor.u32 %v1388_v32, %v1274_v33  ;;  %v1250_v58 = vld [vmem:[%s2073_s5 + $0xa8] sm:$0xf0] }
  0xa1   :  { %590 = vmatmul.bf16.vlgmr.msra.gmra.mxu1 %v124_v37  ;;  %827 = vmatpush.bf16.msrb.mxu0 %v1193_v2  ;;  %v1264_v37 = vld [vmem:[%s2073_s5 + $0xc0] sm:$0xf]  ;;  %v1253_v60 = vor.u32 %v1382_v56, %v1250_v58  ;;  %v1241_v2 = vor.u32 %v1381_v0, %v1240_v63 }
  0xa2   :  { %864 = vmatpush.bf16.msrb.mxu3 %v1277_v34  ;;  %v1265_v42 = vor.u32 %v1387_v39, %v1264_v37 }
  0xa4   :  { %852 = vmatpush.bf16.msrb.mxu2 %v1205_v62  ;;  %839 = vmatpush.bf16.msrb.mxu1 %v1265_v42 }
  0xa5   :  { %828 = vmatpush.bf16.msrb.mxu0 %v1185_v14 }
  0xa7   :  { %603 = vmatmul.bf16.vlgmr.msra.gmra.mxu2 %v125_v46  ;;  %v1269_v46 = vor.u32 %v1386_v44, %v1266_v45  ;;  %v659_v44 = vperm.slane %v657_v41, 0  ;;  %v660_v45 = vperm.slane %v657_v41, 1 }
  0xa8   :  { %616 = vmatmul.bf16.vlgmr.msra.gmra.mxu3 %v126_v49  ;;  %853 = vmatpush.bf16.msrb.mxu2 %v1197_v7  ;;  %v1384_v49 = vld [vmem:[%s2073_s5 + $0xb4] sm:$0xf]  ;;  %v1379_v7 = vld [vmem:[%s2073_s5 + $0x84] sm:$0xf0] }
  0xa9   :  { %829 = vmatpush.bf16.msrb.mxu0 %v1177_v26  ;;  %865 = vmatpush.bf16.msrb.mxu3 %v1269_v46  ;;  %v1261_v52 = vor.u32 %v1384_v49, %v1258_v51  ;;  %v1233_v9 = vor.u32 %v1379_v7, %v1232_v6 }
  0xaa   :  { %840 = vmatpush.bf16.msrb.mxu1 %v1257_v50 }
  0xac   :  { %854 = vmatpush.bf16.msrb.mxu2 %v1189_v19 }
  0xad   :  { %830 = vmatpush.bf16.msrb.mxu0 %v1169_v38  ;;  %866 = vmatpush.bf16.msrb.mxu3 %v1261_v52 }
  0xae   :  { %841 = vmatpush.bf16.msrb.mxu1 %v1249_v57 }
  0xb0   :  { %855 = vmatpush.bf16.msrb.mxu2 %v1181_v31 }
  0xb1   :  { %867 = vmatpush.bf16.msrb.mxu3 %v1253_v60 }
  0xb2   :  { %842 = vmatpush.bf16.msrb.mxu1 %v1241_v2 }
  0xb4   :  { %856 = vmatpush.bf16.msrb.mxu2 %v1173_v43 }
  0xb5   :  { %868 = vmatpush.bf16.msrb.mxu3 %v1245_v4 }
  0xb6   :  { %843 = vmatpush.bf16.msrb.mxu1 %v1233_v9 }
  0xb9   :  { %869 = vmatpush.bf16.msrb.mxu3 %v1237_v12 }
 0x10d   :  { %v526_v59 = vpop.f32.mrf.mxu0 }
 0x10e   :  { %v539_v62 = vpop.f32.mrf.mxu1  ;;  %v527_v5 = vadd.f32 %v526_v59, %v193_v61 }
 0x110   :  { %v540_v14 = vadd.f32 %v539_v62, %v527_v5 }
 0x115   :  { %v528_v11 = vpop.f32.mrf.mxu0 }
 0x116   :  { %v541_v13 = vpop.f32.mrf.mxu1 }
 0x11a   :  { %v552_v15 = vpop.f32.mrf.mxu2 }
 0x11b   :  { %v553_v16 = vadd.f32 %v552_v15, %v540_v14  ;;  %v565_v17 = vpop.f32.mrf.mxu3 }
 0x11d   :  { %v566_v18 = vadd.f32 %v565_v17, %v553_v16  ;;  %v578_v19 = vpop.f32.mrf.mxu0 }
 0x11e   :  { %v591_v20 = vpop.f32.mrf.mxu1  ;;  %v579_v25 = vadd.f32 %v578_v19, %v194_v21 }
 0x11f   :  { %1402 = vtanh.f32 %v566_v18 }
 0x120   :  { %v592_v29 = vadd.f32 %v591_v20, %v579_v25 }
 0x122   :  { %v554_v22 = vpop.f32.mrf.mxu2 }
 0x123   :  { %v567_v23 = vpop.f32.mrf.mxu3 }
 0x125   :  { %v1403_v24 = vpop.eup %1402  ;;  %v580_v26 = vpop.f32.mrf.mxu0 }
 0x126   :  { %v623_v27 = vpack.c.bf16 %v1403_v24, %v1403_v24  ;;  %v593_v28 = vpop.f32.mrf.mxu1 }
 0x128   :  { %831 = vmatmul.bf16.vlgmr.msrb.gmra.mxu0 %v623_v27  ;;  %857 = vmatmul.bf16.vlgmr.msrb.gmra.mxu2 %v623_v27 }
 0x12a   :  { %v604_v30 = vpop.f32.mrf.mxu2 }
 0x12b   :  { %v605_v31 = vadd.f32 %v604_v30, %v592_v29  ;;  %v617_v32 = vpop.f32.mrf.mxu3 }
 0x12d   :  { %v618_v33 = vadd.f32 %v617_v32, %v605_v31 }
 0x12f   :  { %1404 = vtanh.f32 %v618_v33 }
 0x132   :  { %v606_v34 = vpop.f32.mrf.mxu2 }
 0x133   :  { %v619_v35 = vpop.f32.mrf.mxu3 }
 0x135   :  { %v1405_v36 = vpop.eup %1404 }
 0x136   :  { %v624_v37 = vpack.c.bf16 %v1405_v36, %v1405_v36 }
 0x138   :  { %844 = vmatmul.bf16.vlgmr.msrb.gmra.mxu1 %v624_v37  ;;  %870 = vmatmul.bf16.vlgmr.msrb.gmra.mxu3 %v624_v37 }
 0x1a5   :  { %v832_v38 = vpop.f32.mrf.mxu0 }
 0x1a6   :  { %v833_v46 = vadd.f32 %v832_v38, %v659_v44 }
 0x1ab   :  { %v858_v39 = vpop.f32.mrf.mxu2 }
 0x1ac   :  { %v859_v47 = vadd.f32 %v858_v39, %v660_v45 }
 0x1ad   :  { %v834_v40 = vpop.f32.mrf.mxu0 }
 0x1b3   :  { %v860_v42 = vpop.f32.mrf.mxu2 }
 0x1b5   :  { %v845_v43 = vpop.f32.mrf.mxu1 }
 0x1b6   :  { %v846_v49 = vadd.f32 %v845_v43, %v833_v46 }
 0x1bb   :  { %v871_v48 = vpop.f32.mrf.mxu3 }
 0x1bc   :  { %v872_v50 = vadd.f32 %v871_v48, %v859_v47 }
 0x1bd   :  { %v847_v51 = vpop.f32.mrf.mxu1 }
 0x1be   :  { %1406 = vtanh.f32 %v872_v50 }
 0x1bf   :  { %1408 = vtanh.f32 %v846_v49 }
 0x1c3   :  { %v873_v52 = vpop.f32.mrf.mxu3 }
 0x1c4   :  { %v1407_v53 = vpop.eup %1406 }
 0x1c5   :  { %v879_v54 = vrot.slane %v1407_v53, 4  ;;  %v1409_v55 = vpop.eup %1408 }
 0x1c7   :  { %v881_v56 = vsel %vm880_vm1, %v1409_v55, %v879_v54 }
 0x1c8   :  { %885 = vst.msk [vmem:[%s2076_s7] sm:$0xff] %vm884_vm3, %v881_v56 }

</bundles_post_ra>
